<compile_context>
chip_gen: v7x
topology: tpu7x:2x2x1
jax: 0.10.0
libtpu: 0.0.40
codegen_flags: <defaults>
</compile_context>

<pallas_src>
import functools

import jax
import jax.numpy as jnp
from jax import lax
from jax.experimental import pallas as pl
from jax.experimental.pallas import tpu as pltpu


def _mhsa_kernel(x_ref, wq_ref, wk_ref, wv_ref, bq_ref, bk_ref, bv_ref,
                 wo_ref, bo_ref, o_ref, acc_ref, ho_ref, *,
                 heads_per_group, head_dim, kv_block):
    g = pl.program_id(1)
    D = head_dim
    Hg = heads_per_group

    @pl.when(g == 0)
    def _():
        acc_ref[...] = jnp.zeros_like(acc_ref)

    x = x_ref[0]                                                      # (S, E) bf16
    S = x.shape[0]
    num_kv = S // kv_block                                            # static

    # Group-wide projections: bf16 MXU inputs, f32 accumulation, f32 bias add.
    # 1/sqrt(D) is already folded into wq/bq on the host.
    q = (jnp.dot(x, wq_ref[g], preferred_element_type=jnp.float32)
         + bq_ref[g]).astype(jnp.bfloat16)                            # (S, Hg*D)
    k = (jnp.dot(x, wk_ref[g], preferred_element_type=jnp.float32)
         + bk_ref[g]).astype(jnp.bfloat16)
    v = (jnp.dot(x, wv_ref[g], preferred_element_type=jnp.float32)
         + bv_ref[g]).astype(jnp.bfloat16)

    # Per-head attention within the group (static unroll; flash-style online
    # softmax over kv chunks so no (S, S) tile is live).
    for i in range(Hg):
        qh = q[:, i * D:(i + 1) * D]                                  # (S, D)
        m = jnp.full((S, 1), -jnp.inf, dtype=jnp.float32)
        l = jnp.zeros((S, 1), dtype=jnp.float32)
        acc = jnp.zeros((S, D), dtype=jnp.float32)
        for j in range(num_kv):
            kj = k[j * kv_block:(j + 1) * kv_block, i * D:(i + 1) * D]
            vj = v[j * kv_block:(j + 1) * kv_block, i * D:(i + 1) * D]
            # q @ k^T without materializing a transposed tile.
            e = lax.dot_general(qh, kj, (((1,), (1,)), ((), ())),
                                preferred_element_type=jnp.float32)   # (S, kvb)
            m_new = jnp.maximum(m, jnp.max(e, axis=-1, keepdims=True))
            alpha = jnp.exp(m - m_new)
            p = jnp.exp(e - m_new)
            l = alpha * l + jnp.sum(p, axis=-1, keepdims=True)
            acc = alpha * acc + jnp.dot(p.astype(jnp.bfloat16), vj,
                                        preferred_element_type=jnp.float32)
            m = m_new
        # TODO(synk): attention-probability dropout omitted (eval-mode identity).
        ho_ref[:, i * D:(i + 1) * D] = acc * pl.reciprocal(l, approx=True)

    # Fold this group's fc_out contribution straight into the lane-dense
    # (S, E) accumulator: one dot with K = Hg*D.
    acc_ref[...] += jnp.dot(ho_ref[...].astype(jnp.bfloat16), wo_ref[g],
                            preferred_element_type=jnp.float32)       # (S, E)

    @pl.when(g == pl.num_programs(1) - 1)
    def _():
        o_ref[0] = (acc_ref[...] + bo_ref[...]).astype(o_ref.dtype)


def _vmem_limit_bytes(S, E, G, HgD, kv_block, out_itemsize):
    bf = 2
    est = (2 * S * E * bf                       # double-buffered x block (bf16)
           + 2 * S * E * out_itemsize           # double-buffered output block
           + G * (3 * E * HgD + HgD * E) * bf   # resident weights (bf16)
           + G * 3 * HgD * 4 + E * 4            # resident biases (f32)
           + S * E * 4 + S * HgD * 4            # acc + head-out scratch
           + 6 * S * HgD * 4                    # q/k/v + per-head temporaries
           + 2 * S * max(kv_block, 128) * 4)    # energy / probability chunk
    # 2x headroom, capped well below every chip's physical VMEM (v7x = 64 MiB).
    return int(min(48 * 1024 * 1024, max(2 * est, 1 << 20)))


def multi_head_self_attention(x, params, *, num_heads):
    """x: (B, S, E). params: dict of (E,E)/(1,E) weights/biases (PyTorch layout,
    transposed to (in, out))."""
    B, S, E = x.shape
    H = num_heads
    assert E % H == 0, "embed_dim must be divisible by num_heads"
    D = E // H

    # Head-group size: largest divisor of H with Hg*D <= 256 (MXU-friendly
    # contraction / output widths on v6e/v7x, >=128 on v5e where possible).
    Hg = 1
    for cand in range(1, H + 1):
        if H % cand == 0 and cand * D <= 256:
            Hg = cand
    G = H // Hg
    HgD = Hg * D

    # kv chunk for the online softmax: largest of (512, 256, 128) dividing S,
    # otherwise the whole sequence in one chunk.
    kv_block = S
    for cand in (512, 256, 128):
        if S % cand == 0:
            kv_block = cand
            break

    scale = 1.0 / (D ** 0.5)

    # ---- host-side repacking into group-major, bf16 layouts (one-time) ----
    def w_group(w):                 # (E, E) -> (G, E, Hg*D)
        return w.reshape(E, G, Hg, D).transpose(1, 0, 2, 3).reshape(G, E, HgD)

    def b_group(b):                 # (1, E) -> (G, 1, Hg*D)
        return b.reshape(1, G, Hg, D).transpose(1, 0, 2, 3).reshape(G, 1, HgD)

    wq = (w_group(params["wq"]) * scale).astype(jnp.bfloat16)  # scale folded in
    wk = w_group(params["wk"]).astype(jnp.bfloat16)
    wv = w_group(params["wv"]).astype(jnp.bfloat16)
    bq = (b_group(params["bq"]) * scale).astype(jnp.float32)
    bk = b_group(params["bk"]).astype(jnp.float32)
    bv = b_group(params["bv"]).astype(jnp.float32)
    wo = params["wo"].reshape(G, HgD, E).astype(jnp.bfloat16)  # rows: group-major
    bo = params["bo"].astype(jnp.float32)                      # (1, E)
    x_bf = x.astype(jnp.bfloat16)

    kernel = functools.partial(_mhsa_kernel, heads_per_group=Hg,
                               head_dim=D, kv_block=kv_block)

    vmem_limit = _vmem_limit_bytes(S, E, G, HgD, kv_block,
                                   jnp.dtype(x.dtype).itemsize)

    return pl.pallas_call(
        kernel,
        out_shape=jax.ShapeDtypeStruct((B, S, E), x.dtype),
        grid_spec=pltpu.PrefetchScalarGridSpec(
            num_scalar_prefetch=0,
            grid=(B, G),                         # group axis last = reduction
            in_specs=[
                # x: block index constant along g -> fetched once per batch row
                pl.BlockSpec((1, S, E), lambda b, g: (b, 0, 0)),
                # Weights/biases: constant block index across the whole grid ->
                # DMA'd once, resident in VMEM; indexed in-kernel by group id.
                pl.BlockSpec((G, E, HgD), lambda b, g: (0, 0, 0)),    # Wq
                pl.BlockSpec((G, E, HgD), lambda b, g: (0, 0, 0)),    # Wk
                pl.BlockSpec((G, E, HgD), lambda b, g: (0, 0, 0)),    # Wv
                pl.BlockSpec((G, 1, HgD), lambda b, g: (0, 0, 0)),    # bq
                pl.BlockSpec((G, 1, HgD), lambda b, g: (0, 0, 0)),    # bk
                pl.BlockSpec((G, 1, HgD), lambda b, g: (0, 0, 0)),    # bv
                pl.BlockSpec((G, HgD, E), lambda b, g: (0, 0, 0)),    # Wo
                pl.BlockSpec((1, E), lambda b, g: (0, 0)),            # bo
            ],
            # output block constant along g -> stays resident as accumulator
            out_specs=pl.BlockSpec((1, S, E), lambda b, g: (b, 0, 0)),
            scratch_shapes=[pltpu.VMEM((S, E), jnp.float32),     # fc_out acc
                            pltpu.VMEM((S, HgD), jnp.float32)],  # group head-out
        ),
        compiler_params=pltpu.CompilerParams(
            dimension_semantics=("parallel", "arbitrary"),
            vmem_limit_bytes=vmem_limit),
    )(x_bf, wq, wk, wv, bq, bk, bv, wo, bo)


def _reference(x, params, *, num_heads):
    """Plain-JAX f32 reference mirroring the PyTorch forward (eval-mode dropout)."""
    B, S, E = x.shape
    D = E // num_heads

    def lin(x, w, b):
        return x @ w + b[0]

    q = lin(x, params["wq"], params["bq"]).reshape(B, S, num_heads, D).transpose(0, 2, 1, 3)
    k = lin(x, params["wk"], params["bk"]).reshape(B, S, num_heads, D).transpose(0, 2, 1, 3)
    v = lin(x, params["wv"], params["bv"]).reshape(B, S, num_heads, D).transpose(0, 2, 1, 3)

    energy = jnp.einsum("bhqd,bhkd->bhqk", q, k) / (D ** 0.5)
    attn = jax.nn.softmax(energy, axis=-1)
    out = jnp.einsum("bhqk,bhkd->bhqd", attn, v)
    out = out.transpose(0, 2, 1, 3).reshape(B, S, E)
    return lin(out, params["wo"], params["bo"])


if __name__ == "__main__":
    B, S, E, H = 2, 8, 32, 4   # batch, seq, embed_dim, num_heads

    key = jax.random.PRNGKey(0)
    keys = jax.random.split(key, 9)
    scale = 1.0 / (E ** 0.5)
    params = {
        "wq": jax.random.normal(keys[0], (E, E), jnp.float32) * scale,
        "bq": jax.random.normal(keys[1], (1, E), jnp.float32) * 0.01,
        "wk": jax.random.normal(keys[2], (E, E), jnp.float32) * scale,
        "bk": jax.random.normal(keys[3], (1, E), jnp.float32) * 0.01,
        "wv": jax.random.normal(keys[4], (E, E), jnp.float32) * scale,
        "bv": jax.random.normal(keys[5], (1, E), jnp.float32) * 0.01,
        "wo": jax.random.normal(keys[6], (E, E), jnp.float32) * scale,
        "bo": jax.random.normal(keys[7], (1, E), jnp.float32) * 0.01,
    }
    x = jax.random.normal(keys[8], (B, S, E), jnp.float32)

    out = multi_head_self_attention(x, params, num_heads=H)
    out = jax.block_until_ready(out)

    ref = _reference(x, params, num_heads=H)
    assert out.shape == (B, S, E)
    # Tolerance reflects the intentional bf16 MXU inputs (per perf review) plus
    # the EUP approximate reciprocal in the softmax denominator; measured error
    # is ~1e-2-scale vs the full-f32 reference.
    assert jnp.allclose(out, ref, atol=2e-2, rtol=2e-2), "mismatch vs reference"

    print("KERNEL_OK")
</pallas_src>

<mosaic_0001>
module attributes {stable_mosaic.version = 11 : i64} {
  func.func @_mhsa_kernel(%arg0: i32, %arg1: i32, %arg2: memref<1x8x32xbf16, #tpu.memory_space<vmem>>, %arg3: memref<1x32x32xbf16, #tpu.memory_space<vmem>>, %arg4: memref<1x32x32xbf16, #tpu.memory_space<vmem>>, %arg5: memref<1x32x32xbf16, #tpu.memory_space<vmem>>, %arg6: memref<1x1x32xf32, #tpu.memory_space<vmem>>, %arg7: memref<1x1x32xf32, #tpu.memory_space<vmem>>, %arg8: memref<1x1x32xf32, #tpu.memory_space<vmem>>, %arg9: memref<1x32x32xbf16, #tpu.memory_space<vmem>>, %arg10: memref<1x32xf32, #tpu.memory_space<vmem>>, %arg11: memref<1x8x32xf32, #tpu.memory_space<vmem>>, %arg12: memref<8x32xf32, #tpu.memory_space<vmem>>, %arg13: memref<8x32xf32, #tpu.memory_space<vmem>>) attributes {dimension_semantics = [#tpu.dimension_semantics<parallel>, #tpu.dimension_semantics<arbitrary>], iteration_bounds = array<i64: 2, 1>, scalar_prefetch = 0 : i64, scratch_operands = 2 : i64, tpu.core_type = #tpu.core_type<tc>, window_params = [{transform_indices = @transform_0, window_bounds = array<i64: 1, 8, 32>}, {pipeline_mode = #tpu.pipeline_mode<synchronous>, transform_indices = @transform_1, window_bounds = array<i64: 1, 32, 32>}, {pipeline_mode = #tpu.pipeline_mode<synchronous>, transform_indices = @transform_2, window_bounds = array<i64: 1, 32, 32>}, {pipeline_mode = #tpu.pipeline_mode<synchronous>, transform_indices = @transform_3, window_bounds = array<i64: 1, 32, 32>}, {pipeline_mode = #tpu.pipeline_mode<synchronous>, transform_indices = @transform_4, window_bounds = array<i64: 1, 1, 32>}, {pipeline_mode = #tpu.pipeline_mode<synchronous>, transform_indices = @transform_5, window_bounds = array<i64: 1, 1, 32>}, {pipeline_mode = #tpu.pipeline_mode<synchronous>, transform_indices = @transform_6, window_bounds = array<i64: 1, 1, 32>}, {pipeline_mode = #tpu.pipeline_mode<synchronous>, transform_indices = @transform_7, window_bounds = array<i64: 1, 32, 32>}, {pipeline_mode = #tpu.pipeline_mode<synchronous>, transform_indices = @transform_8, window_bounds = array<i64: 1, 32>}, {transform_indices = @transform_9, window_bounds = array<i64: 1, 8, 32>}]} {
    %c0_i32 = arith.constant 0 : i32
    %0 = arith.cmpi eq, %arg1, %c0_i32 : i32
    %1 = arith.extui %0 : i1 to i32
    %c0_i32_0 = arith.constant 0 : i32
    %2 = arith.cmpi ne, %1, %c0_i32_0 : i32
    scf.if %2 {
      %cst_61 = arith.constant 0.000000e+00 : f32
      %159 = vector.broadcast %cst_61 : f32 to vector<8x32xf32>
      %c0_62 = arith.constant 0 : index
      %c0_63 = arith.constant 0 : index
      %160 = vector.load %arg12[%c0_62, %c0_63] : memref<8x32xf32, #tpu.memory_space<vmem>>, vector<8x32xf32>
      tpu.vector_store %arg12[%c0_62, %c0_63], %159 {strides = array<i32>} : memref<8x32xf32, #tpu.memory_space<vmem>>, vector<8x32xf32>,
    } else {
    }
    %c0 = arith.constant 0 : index
    %c0_1 = arith.constant 0 : index
    %c0_2 = arith.constant 0 : index
    %3 = vector.load %arg2[%c0, %c0_1, %c0_2] : memref<1x8x32xbf16, #tpu.memory_space<vmem>>, vector<1x8x32xbf16>
    %4 = vector.shape_cast %3 : vector<1x8x32xbf16> to vector<8x32xbf16>
    %5 = arith.index_cast %arg1 : i32 to index
    %c0_3 = arith.constant 0 : index
    %c0_4 = arith.constant 0 : index
    %6 = vector.load %arg3[%5, %c0_3, %c0_4] : memref<1x32x32xbf16, #tpu.memory_space<vmem>>, vector<1x32x32xbf16>
    %7 = vector.shape_cast %6 : vector<1x32x32xbf16> to vector<32x32xbf16>
    %cst = arith.constant dense<0.000000e+00> : vector<8x32xf32>
    %8 = tpu.matmul %4, %7, %cst {dimension_numbers = #tpu.dot_dimension_numbers<[1], [0], [0], [1], [0, 0, 1, 1], [], []>} : vector<8x32xbf16>, vector<32x32xbf16>, vector<8x32xf32> -> vector<8x32xf32>
    %9 = arith.index_cast %arg1 : i32 to index
    %c0_5 = arith.constant 0 : index
    %c0_6 = arith.constant 0 : index
    %10 = vector.load %arg6[%9, %c0_5, %c0_6] : memref<1x1x32xf32, #tpu.memory_space<vmem>>, vector<1x1x32xf32>
    %11 = vector.shape_cast %10 : vector<1x1x32xf32> to vector<1x32xf32>
    %12 = vector.broadcast %11 : vector<1x32xf32> to vector<8x32xf32>
    %13 = arith.addf %8, %12 : vector<8x32xf32>
    %14 = arith.truncf %13 : vector<8x32xf32> to vector<8x32xbf16>
    %15 = arith.index_cast %arg1 : i32 to index
    %c0_7 = arith.constant 0 : index
    %c0_8 = arith.constant 0 : index
    %16 = vector.load %arg4[%15, %c0_7, %c0_8] : memref<1x32x32xbf16, #tpu.memory_space<vmem>>, vector<1x32x32xbf16>
    %17 = vector.shape_cast %16 : vector<1x32x32xbf16> to vector<32x32xbf16>
    %cst_9 = arith.constant dense<0.000000e+00> : vector<8x32xf32>
    %18 = tpu.matmul %4, %17, %cst_9 {dimension_numbers = #tpu.dot_dimension_numbers<[1], [0], [0], [1], [0, 0, 1, 1], [], []>} : vector<8x32xbf16>, vector<32x32xbf16>, vector<8x32xf32> -> vector<8x32xf32>
    %19 = arith.index_cast %arg1 : i32 to index
    %c0_10 = arith.constant 0 : index
    %c0_11 = arith.constant 0 : index
    %20 = vector.load %arg7[%19, %c0_10, %c0_11] : memref<1x1x32xf32, #tpu.memory_space<vmem>>, vector<1x1x32xf32>
    %21 = vector.shape_cast %20 : vector<1x1x32xf32> to vector<1x32xf32>
    %22 = vector.broadcast %21 : vector<1x32xf32> to vector<8x32xf32>
    %23 = arith.addf %18, %22 : vector<8x32xf32>
    %24 = arith.truncf %23 : vector<8x32xf32> to vector<8x32xbf16>
    %25 = arith.index_cast %arg1 : i32 to index
    %c0_12 = arith.constant 0 : index
    %c0_13 = arith.constant 0 : index
    %26 = vector.load %arg5[%25, %c0_12, %c0_13] : memref<1x32x32xbf16, #tpu.memory_space<vmem>>, vector<1x32x32xbf16>
    %27 = vector.shape_cast %26 : vector<1x32x32xbf16> to vector<32x32xbf16>
    %cst_14 = arith.constant dense<0.000000e+00> : vector<8x32xf32>
    %28 = tpu.matmul %4, %27, %cst_14 {dimension_numbers = #tpu.dot_dimension_numbers<[1], [0], [0], [1], [0, 0, 1, 1], [], []>} : vector<8x32xbf16>, vector<32x32xbf16>, vector<8x32xf32> -> vector<8x32xf32>
    %29 = arith.index_cast %arg1 : i32 to index
    %c0_15 = arith.constant 0 : index
    %c0_16 = arith.constant 0 : index
    %30 = vector.load %arg8[%29, %c0_15, %c0_16] : memref<1x1x32xf32, #tpu.memory_space<vmem>>, vector<1x1x32xf32>
    %31 = vector.shape_cast %30 : vector<1x1x32xf32> to vector<1x32xf32>
    %32 = vector.broadcast %31 : vector<1x32xf32> to vector<8x32xf32>
    %33 = arith.addf %28, %32 : vector<8x32xf32>
    %34 = arith.truncf %33 : vector<8x32xf32> to vector<8x32xbf16>
    %35 = vector.extract_strided_slice %14 {offsets = [0, 0], sizes = [8, 8], strides = [1, 1]} : vector<8x32xbf16> to vector<8x8xbf16>
    %cst_17 = arith.constant 0xFF800000 : f32
    %36 = vector.broadcast %cst_17 : f32 to vector<8x1xf32>
    %cst_18 = arith.constant 0.000000e+00 : f32
    %37 = vector.broadcast %cst_18 : f32 to vector<8x1xf32>
    %cst_19 = arith.constant 0.000000e+00 : f32
    %38 = vector.broadcast %cst_19 : f32 to vector<8x8xf32>
    %39 = vector.extract_strided_slice %24 {offsets = [0, 0], sizes = [8, 8], strides = [1, 1]} : vector<8x32xbf16> to vector<8x8xbf16>
    %40 = vector.extract_strided_slice %34 {offsets = [0, 0], sizes = [8, 8], strides = [1, 1]} : vector<8x32xbf16> to vector<8x8xbf16>
    %cst_20 = arith.constant dense<0.000000e+00> : vector<8x8xf32>
    %41 = tpu.matmul %35, %39, %cst_20 {dimension_numbers = #tpu.dot_dimension_numbers<[1], [1], [0], [0], [0, 0, 1, 0], [], []>} : vector<8x8xbf16>, vector<8x8xbf16>, vector<8x8xf32> -> vector<8x8xf32>
    %cst_21 = arith.constant dense<0xFF800000> : vector<8xf32>
    %42 = vector.multi_reduction <maximumf>, %41, %cst_21 [1] : vector<8x8xf32> to vector<8xf32>
    %43 = vector.shape_cast %42 : vector<8xf32> to vector<8x1xf32>
    %44 = arith.maximumf %36, %43 : vector<8x1xf32>
    %45 = arith.subf %36, %44 : vector<8x1xf32>
    %46 = math.exp %45 : vector<8x1xf32>
    %47 = vector.broadcast %44 : vector<8x1xf32> to vector<8x8xf32>
    %48 = arith.subf %41, %47 : vector<8x8xf32>
    %49 = math.exp %48 : vector<8x8xf32>
    %50 = arith.mulf %46, %37 : vector<8x1xf32>
    %cst_22 = arith.constant dense<0.000000e+00> : vector<8xf32>
    %51 = vector.multi_reduction <add>, %49, %cst_22 [1] : vector<8x8xf32> to vector<8xf32>
    %52 = vector.shape_cast %51 : vector<8xf32> to vector<8x1xf32>
    %53 = arith.addf %50, %52 : vector<8x1xf32>
    %54 = vector.broadcast %46 : vector<8x1xf32> to vector<8x8xf32>
    %55 = arith.mulf %54, %38 : vector<8x8xf32>
    %56 = arith.truncf %49 : vector<8x8xf32> to vector<8x8xbf16>
    %cst_23 = arith.constant dense<0.000000e+00> : vector<8x8xf32>
    %57 = tpu.matmul %56, %40, %cst_23 {dimension_numbers = #tpu.dot_dimension_numbers<[1], [0], [0], [1], [0, 0, 1, 1], [], []>} : vector<8x8xbf16>, vector<8x8xbf16>, vector<8x8xf32> -> vector<8x8xf32>
    %58 = arith.addf %55, %57 : vector<8x8xf32>
    %59 = tpu.reciprocal %53 {approx = true} : vector<8x1xf32> -> vector<8x1xf32>
    %60 = vector.broadcast %59 : vector<8x1xf32> to vector<8x8xf32>
    %61 = arith.mulf %58, %60 : vector<8x8xf32>
    %c0_24 = arith.constant 0 : index
    %c0_25 = arith.constant 0 : index
    %62 = vector.load %arg13[%c0_24, %c0_25] : memref<8x32xf32, #tpu.memory_space<vmem>>, vector<8x8xf32>
    tpu.vector_store %arg13[%c0_24, %c0_25], %61 {strides = array<i32>} : memref<8x32xf32, #tpu.memory_space<vmem>>, vector<8x8xf32>,
    %63 = vector.extract_strided_slice %14 {offsets = [0, 8], sizes = [8, 8], strides = [1, 1]} : vector<8x32xbf16> to vector<8x8xbf16>
    %cst_26 = arith.constant 0xFF800000 : f32
    %64 = vector.broadcast %cst_26 : f32 to vector<8x1xf32>
    %cst_27 = arith.constant 0.000000e+00 : f32
    %65 = vector.broadcast %cst_27 : f32 to vector<8x1xf32>
    %cst_28 = arith.constant 0.000000e+00 : f32
    %66 = vector.broadcast %cst_28 : f32 to vector<8x8xf32>
    %67 = vector.extract_strided_slice %24 {offsets = [0, 8], sizes = [8, 8], strides = [1, 1]} : vector<8x32xbf16> to vector<8x8xbf16>
    %68 = vector.extract_strided_slice %34 {offsets = [0, 8], sizes = [8, 8], strides = [1, 1]} : vector<8x32xbf16> to vector<8x8xbf16>
    %cst_29 = arith.constant dense<0.000000e+00> : vector<8x8xf32>
    %69 = tpu.matmul %63, %67, %cst_29 {dimension_numbers = #tpu.dot_dimension_numbers<[1], [1], [0], [0], [0, 0, 1, 0], [], []>} : vector<8x8xbf16>, vector<8x8xbf16>, vector<8x8xf32> -> vector<8x8xf32>
    %cst_30 = arith.constant dense<0xFF800000> : vector<8xf32>
    %70 = vector.multi_reduction <maximumf>, %69, %cst_30 [1] : vector<8x8xf32> to vector<8xf32>
    %71 = vector.shape_cast %70 : vector<8xf32> to vector<8x1xf32>
    %72 = arith.maximumf %64, %71 : vector<8x1xf32>
    %73 = arith.subf %64, %72 : vector<8x1xf32>
    %74 = math.exp %73 : vector<8x1xf32>
    %75 = vector.broadcast %72 : vector<8x1xf32> to vector<8x8xf32>
    %76 = arith.subf %69, %75 : vector<8x8xf32>
    %77 = math.exp %76 : vector<8x8xf32>
    %78 = arith.mulf %74, %65 : vector<8x1xf32>
    %cst_31 = arith.constant dense<0.000000e+00> : vector<8xf32>
    %79 = vector.multi_reduction <add>, %77, %cst_31 [1] : vector<8x8xf32> to vector<8xf32>
    %80 = vector.shape_cast %79 : vector<8xf32> to vector<8x1xf32>
    %81 = arith.addf %78, %80 : vector<8x1xf32>
    %82 = vector.broadcast %74 : vector<8x1xf32> to vector<8x8xf32>
    %83 = arith.mulf %82, %66 : vector<8x8xf32>
    %84 = arith.truncf %77 : vector<8x8xf32> to vector<8x8xbf16>
    %cst_32 = arith.constant dense<0.000000e+00> : vector<8x8xf32>
    %85 = tpu.matmul %84, %68, %cst_32 {dimension_numbers = #tpu.dot_dimension_numbers<[1], [0], [0], [1], [0, 0, 1, 1], [], []>} : vector<8x8xbf16>, vector<8x8xbf16>, vector<8x8xf32> -> vector<8x8xf32>
    %86 = arith.addf %83, %85 : vector<8x8xf32>
    %87 = tpu.reciprocal %81 {approx = true} : vector<8x1xf32> -> vector<8x1xf32>
    %88 = vector.broadcast %87 : vector<8x1xf32> to vector<8x8xf32>
    %89 = arith.mulf %86, %88 : vector<8x8xf32>
    %c0_33 = arith.constant 0 : index
    %c8 = arith.constant 8 : index
    %90 = vector.load %arg13[%c0_33, %c8] : memref<8x32xf32, #tpu.memory_space<vmem>>, vector<8x8xf32>
    tpu.vector_store %arg13[%c0_33, %c8], %89 {strides = array<i32>} : memref<8x32xf32, #tpu.memory_space<vmem>>, vector<8x8xf32>,
    %91 = vector.extract_strided_slice %14 {offsets = [0, 16], sizes = [8, 8], strides = [1, 1]} : vector<8x32xbf16> to vector<8x8xbf16>
    %cst_34 = arith.constant 0xFF800000 : f32
    %92 = vector.broadcast %cst_34 : f32 to vector<8x1xf32>
    %cst_35 = arith.constant 0.000000e+00 : f32
    %93 = vector.broadcast %cst_35 : f32 to vector<8x1xf32>
    %cst_36 = arith.constant 0.000000e+00 : f32
    %94 = vector.broadcast %cst_36 : f32 to vector<8x8xf32>
    %95 = vector.extract_strided_slice %24 {offsets = [0, 16], sizes = [8, 8], strides = [1, 1]} : vector<8x32xbf16> to vector<8x8xbf16>
    %96 = vector.extract_strided_slice %34 {offsets = [0, 16], sizes = [8, 8], strides = [1, 1]} : vector<8x32xbf16> to vector<8x8xbf16>
    %cst_37 = arith.constant dense<0.000000e+00> : vector<8x8xf32>
    %97 = tpu.matmul %91, %95, %cst_37 {dimension_numbers = #tpu.dot_dimension_numbers<[1], [1], [0], [0], [0, 0, 1, 0], [], []>} : vector<8x8xbf16>, vector<8x8xbf16>, vector<8x8xf32> -> vector<8x8xf32>
    %cst_38 = arith.constant dense<0xFF800000> : vector<8xf32>
    %98 = vector.multi_reduction <maximumf>, %97, %cst_38 [1] : vector<8x8xf32> to vector<8xf32>
    %99 = vector.shape_cast %98 : vector<8xf32> to vector<8x1xf32>
    %100 = arith.maximumf %92, %99 : vector<8x1xf32>
    %101 = arith.subf %92, %100 : vector<8x1xf32>
    %102 = math.exp %101 : vector<8x1xf32>
    %103 = vector.broadcast %100 : vector<8x1xf32> to vector<8x8xf32>
    %104 = arith.subf %97, %103 : vector<8x8xf32>
    %105 = math.exp %104 : vector<8x8xf32>
    %106 = arith.mulf %102, %93 : vector<8x1xf32>
    %cst_39 = arith.constant dense<0.000000e+00> : vector<8xf32>
    %107 = vector.multi_reduction <add>, %105, %cst_39 [1] : vector<8x8xf32> to vector<8xf32>
    %108 = vector.shape_cast %107 : vector<8xf32> to vector<8x1xf32>
    %109 = arith.addf %106, %108 : vector<8x1xf32>
    %110 = vector.broadcast %102 : vector<8x1xf32> to vector<8x8xf32>
    %111 = arith.mulf %110, %94 : vector<8x8xf32>
    %112 = arith.truncf %105 : vector<8x8xf32> to vector<8x8xbf16>
    %cst_40 = arith.constant dense<0.000000e+00> : vector<8x8xf32>
    %113 = tpu.matmul %112, %96, %cst_40 {dimension_numbers = #tpu.dot_dimension_numbers<[1], [0], [0], [1], [0, 0, 1, 1], [], []>} : vector<8x8xbf16>, vector<8x8xbf16>, vector<8x8xf32> -> vector<8x8xf32>
    %114 = arith.addf %111, %113 : vector<8x8xf32>
    %115 = tpu.reciprocal %109 {approx = true} : vector<8x1xf32> -> vector<8x1xf32>
    %116 = vector.broadcast %115 : vector<8x1xf32> to vector<8x8xf32>
    %117 = arith.mulf %114, %116 : vector<8x8xf32>
    %c0_41 = arith.constant 0 : index
    %c16 = arith.constant 16 : index
    %118 = vector.load %arg13[%c0_41, %c16] : memref<8x32xf32, #tpu.memory_space<vmem>>, vector<8x8xf32>
    tpu.vector_store %arg13[%c0_41, %c16], %117 {strides = array<i32>} : memref<8x32xf32, #tpu.memory_space<vmem>>, vector<8x8xf32>,
    %119 = vector.extract_strided_slice %14 {offsets = [0, 24], sizes = [8, 8], strides = [1, 1]} : vector<8x32xbf16> to vector<8x8xbf16>
    %cst_42 = arith.constant 0xFF800000 : f32
    %120 = vector.broadcast %cst_42 : f32 to vector<8x1xf32>
    %cst_43 = arith.constant 0.000000e+00 : f32
    %121 = vector.broadcast %cst_43 : f32 to vector<8x1xf32>
    %cst_44 = arith.constant 0.000000e+00 : f32
    %122 = vector.broadcast %cst_44 : f32 to vector<8x8xf32>
    %123 = vector.extract_strided_slice %24 {offsets = [0, 24], sizes = [8, 8], strides = [1, 1]} : vector<8x32xbf16> to vector<8x8xbf16>
    %124 = vector.extract_strided_slice %34 {offsets = [0, 24], sizes = [8, 8], strides = [1, 1]} : vector<8x32xbf16> to vector<8x8xbf16>
    %cst_45 = arith.constant dense<0.000000e+00> : vector<8x8xf32>
    %125 = tpu.matmul %119, %123, %cst_45 {dimension_numbers = #tpu.dot_dimension_numbers<[1], [1], [0], [0], [0, 0, 1, 0], [], []>} : vector<8x8xbf16>, vector<8x8xbf16>, vector<8x8xf32> -> vector<8x8xf32>
    %cst_46 = arith.constant dense<0xFF800000> : vector<8xf32>
    %126 = vector.multi_reduction <maximumf>, %125, %cst_46 [1] : vector<8x8xf32> to vector<8xf32>
    %127 = vector.shape_cast %126 : vector<8xf32> to vector<8x1xf32>
    %128 = arith.maximumf %120, %127 : vector<8x1xf32>
    %129 = arith.subf %120, %128 : vector<8x1xf32>
    %130 = math.exp %129 : vector<8x1xf32>
    %131 = vector.broadcast %128 : vector<8x1xf32> to vector<8x8xf32>
    %132 = arith.subf %125, %131 : vector<8x8xf32>
    %133 = math.exp %132 : vector<8x8xf32>
    %134 = arith.mulf %130, %121 : vector<8x1xf32>
    %cst_47 = arith.constant dense<0.000000e+00> : vector<8xf32>
    %135 = vector.multi_reduction <add>, %133, %cst_47 [1] : vector<8x8xf32> to vector<8xf32>
    %136 = vector.shape_cast %135 : vector<8xf32> to vector<8x1xf32>
    %137 = arith.addf %134, %136 : vector<8x1xf32>
    %138 = vector.broadcast %130 : vector<8x1xf32> to vector<8x8xf32>
    %139 = arith.mulf %138, %122 : vector<8x8xf32>
    %140 = arith.truncf %133 : vector<8x8xf32> to vector<8x8xbf16>
    %cst_48 = arith.constant dense<0.000000e+00> : vector<8x8xf32>
    %141 = tpu.matmul %140, %124, %cst_48 {dimension_numbers = #tpu.dot_dimension_numbers<[1], [0], [0], [1], [0, 0, 1, 1], [], []>} : vector<8x8xbf16>, vector<8x8xbf16>, vector<8x8xf32> -> vector<8x8xf32>
    %142 = arith.addf %139, %141 : vector<8x8xf32>
    %143 = tpu.reciprocal %137 {approx = true} : vector<8x1xf32> -> vector<8x1xf32>
    %144 = vector.broadcast %143 : vector<8x1xf32> to vector<8x8xf32>
    %145 = arith.mulf %142, %144 : vector<8x8xf32>
    %c0_49 = arith.constant 0 : index
    %c24 = arith.constant 24 : index
    %146 = vector.load %arg13[%c0_49, %c24] : memref<8x32xf32, #tpu.memory_space<vmem>>, vector<8x8xf32>
    tpu.vector_store %arg13[%c0_49, %c24], %145 {strides = array<i32>} : memref<8x32xf32, #tpu.memory_space<vmem>>, vector<8x8xf32>,
    %c0_50 = arith.constant 0 : index
    %c0_51 = arith.constant 0 : index
    %147 = vector.load %arg12[%c0_50, %c0_51] : memref<8x32xf32, #tpu.memory_space<vmem>>, vector<8x32xf32>
    %c0_52 = arith.constant 0 : index
    %c0_53 = arith.constant 0 : index
    %148 = vector.load %arg13[%c0_52, %c0_53] : memref<8x32xf32, #tpu.memory_space<vmem>>, vector<8x32xf32>
    %149 = arith.truncf %148 : vector<8x32xf32> to vector<8x32xbf16>
    %150 = arith.index_cast %arg1 : i32 to index
    %c0_54 = arith.constant 0 : index
    %c0_55 = arith.constant 0 : index
    %151 = vector.load %arg9[%150, %c0_54, %c0_55] : memref<1x32x32xbf16, #tpu.memory_space<vmem>>, vector<1x32x32xbf16>
    %152 = vector.shape_cast %151 : vector<1x32x32xbf16> to vector<32x32xbf16>
    %cst_56 = arith.constant dense<0.000000e+00> : vector<8x32xf32>
    %153 = tpu.matmul %149, %152, %cst_56 {dimension_numbers = #tpu.dot_dimension_numbers<[1], [0], [0], [1], [0, 0, 1, 1], [], []>} : vector<8x32xbf16>, vector<32x32xbf16>, vector<8x32xf32> -> vector<8x32xf32>
    %154 = arith.addf %147, %153 : vector<8x32xf32>
    %c0_57 = arith.constant 0 : index
    %c0_58 = arith.constant 0 : index
    %155 = vector.load %arg12[%c0_57, %c0_58] : memref<8x32xf32, #tpu.memory_space<vmem>>, vector<8x32xf32>
    tpu.vector_store %arg12[%c0_57, %c0_58], %154 {strides = array<i32>} : memref<8x32xf32, #tpu.memory_space<vmem>>, vector<8x32xf32>,
    %c0_i32_59 = arith.constant 0 : i32
    %156 = arith.cmpi eq, %arg1, %c0_i32_59 : i32
    %157 = arith.extui %156 : i1 to i32
    %c0_i32_60 = arith.constant 0 : i32
    %158 = arith.cmpi ne, %157, %c0_i32_60 : i32
    scf.if %158 {
      %c0_61 = arith.constant 0 : index
      %c0_62 = arith.constant 0 : index
      %159 = vector.load %arg12[%c0_61, %c0_62] : memref<8x32xf32, #tpu.memory_space<vmem>>, vector<8x32xf32>
      %c0_63 = arith.constant 0 : index
      %c0_64 = arith.constant 0 : index
      %160 = vector.load %arg10[%c0_63, %c0_64] : memref<1x32xf32, #tpu.memory_space<vmem>>, vector<1x32xf32>
      %161 = vector.broadcast %160 : vector<1x32xf32> to vector<8x32xf32>
      %162 = arith.addf %159, %161 : vector<8x32xf32>
      %c0_65 = arith.constant 0 : index
      %c0_66 = arith.constant 0 : index
      %c0_67 = arith.constant 0 : index
      %163 = vector.load %arg11[%c0_65, %c0_66, %c0_67] : memref<1x8x32xf32, #tpu.memory_space<vmem>>, vector<1x8x32xf32>
      %164 = vector.shape_cast %163 : vector<1x8x32xf32> to vector<8x32xf32>
      %165 = vector.shape_cast %162 : vector<8x32xf32> to vector<1x8x32xf32>
      tpu.vector_store %arg11[%c0_65, %c0_66, %c0_67], %165 {strides = array<i32>} : memref<1x8x32xf32, #tpu.memory_space<vmem>>, vector<1x8x32xf32>,
    } else {
    }
    return
  }
  func.func @transform_0(%arg0: i32, %arg1: i32) -> (i32, i32, i32) {
    %c0_i32 = arith.constant 0 : i32
    %c0_i32_0 = arith.constant 0 : i32
    %c0_i32_1 = arith.constant 0 : i32
    return %arg0, %c0_i32, %c0_i32_0 : i32, i32, i32
  }
  func.func @transform_1(%arg0: i32, %arg1: i32) -> (i32, i32, i32) {
    %c0_i32 = arith.constant 0 : i32
    %c0_i32_0 = arith.constant 0 : i32
    %c0_i32_1 = arith.constant 0 : i32
    %c0_i32_2 = arith.constant 0 : i32
    return %c0_i32, %c0_i32_0, %c0_i32_1 : i32, i32, i32
  }
  func.func @transform_2(%arg0: i32, %arg1: i32) -> (i32, i32, i32) {
    %c0_i32 = arith.constant 0 : i32
    %c0_i32_0 = arith.constant 0 : i32
    %c0_i32_1 = arith.constant 0 : i32
    %c0_i32_2 = arith.constant 0 : i32
    return %c0_i32, %c0_i32_0, %c0_i32_1 : i32, i32, i32
  }
  func.func @transform_3(%arg0: i32, %arg1: i32) -> (i32, i32, i32) {
    %c0_i32 = arith.constant 0 : i32
    %c0_i32_0 = arith.constant 0 : i32
    %c0_i32_1 = arith.constant 0 : i32
    %c0_i32_2 = arith.constant 0 : i32
    return %c0_i32, %c0_i32_0, %c0_i32_1 : i32, i32, i32
  }
  func.func @transform_4(%arg0: i32, %arg1: i32) -> (i32, i32, i32) {
    %c0_i32 = arith.constant 0 : i32
    %c0_i32_0 = arith.constant 0 : i32
    %c0_i32_1 = arith.constant 0 : i32
    %c0_i32_2 = arith.constant 0 : i32
    return %c0_i32, %c0_i32_0, %c0_i32_1 : i32, i32, i32
  }
  func.func @transform_5(%arg0: i32, %arg1: i32) -> (i32, i32, i32) {
    %c0_i32 = arith.constant 0 : i32
    %c0_i32_0 = arith.constant 0 : i32
    %c0_i32_1 = arith.constant 0 : i32
    %c0_i32_2 = arith.constant 0 : i32
    return %c0_i32, %c0_i32_0, %c0_i32_1 : i32, i32, i32
  }
  func.func @transform_6(%arg0: i32, %arg1: i32) -> (i32, i32, i32) {
    %c0_i32 = arith.constant 0 : i32
    %c0_i32_0 = arith.constant 0 : i32
    %c0_i32_1 = arith.constant 0 : i32
    %c0_i32_2 = arith.constant 0 : i32
    return %c0_i32, %c0_i32_0, %c0_i32_1 : i32, i32, i32
  }
  func.func @transform_7(%arg0: i32, %arg1: i32) -> (i32, i32, i32) {
    %c0_i32 = arith.constant 0 : i32
    %c0_i32_0 = arith.constant 0 : i32
    %c0_i32_1 = arith.constant 0 : i32
    %c0_i32_2 = arith.constant 0 : i32
    return %c0_i32, %c0_i32_0, %c0_i32_1 : i32, i32, i32
  }
  func.func @transform_8(%arg0: i32, %arg1: i32) -> (i32, i32) {
    %c0_i32 = arith.constant 0 : i32
    %c0_i32_0 = arith.constant 0 : i32
    %c0_i32_1 = arith.constant 0 : i32
    return %c0_i32, %c0_i32_0 : i32, i32
  }
  func.func @transform_9(%arg0: i32, %arg1: i32) -> (i32, i32, i32) {
    %c0_i32 = arith.constant 0 : i32
    %c0_i32_0 = arith.constant 0 : i32
    %c0_i32_1 = arith.constant 0 : i32
    return %arg0, %c0_i32, %c0_i32_0 : i32, i32, i32
  }
}

</mosaic_0001>

<bundles_post_ra>
// kernel: tpu_custom_call.1
= control target key start
LH: loop header
LB: loop body
LE: loop exit
PB: predicated region body
PF: predicated region fallthrough
CT: control target
= control target key end

     0   :  { %s2253_s0 = inlined_call_operand.hbm [shape: bf16[2,8,32], index: 0, kind: input, shape index: {}]   ;;  %s2254_s1 = inlined_call_operand.hbm [shape: bf16[1,32,32], index: 1, kind: input, shape index: {}]   ;;  %s2255_s2 = inlined_call_operand.hbm [shape: bf16[1,32,32], index: 2, kind: input, shape index: {}]   ;;  %s2256_s3 = inlined_call_operand.hbm [shape: bf16[1,32,32], index: 3, kind: input, shape index: {}]   ;;  %s2257_s4 = inlined_call_operand.vmem [shape: f32[1,1,32], index: 4, kind: input, shape index: {}]   ;;  %s2258_s5 = inlined_call_operand.vmem [shape: f32[1,1,32], index: 5, kind: input, shape index: {}]   ;;  %s2259_s6 = inlined_call_operand.vmem [shape: f32[1,1,32], index: 6, kind: input, shape index: {}]   ;;  %s2260_s7 = inlined_call_operand.vmem [shape: bf16[1,32,32], index: 7, kind: input, shape index: {}]   ;;  %s2261_s8 = inlined_call_operand.vmem [shape: f32[1,32], index: 8, kind: input, shape index: {}]   ;;  %s2262_s9 = inlined_call_operand.hbm [shape: f32[2,8,32], index: 9, kind: output, shape index: {}]  }
   0x1   :  { %2271 = sst [smem:[#allocation20_spill]] %s2260_s7 }
   0x2   :  { %2272 = sst [smem:[#allocation21_spill]] %s2261_s8 }
   0x3   :  { %2273 = sst [smem:[#allocation22_spill]] %s2262_s9 }
   0x4   :  { %14 = vsyncpa [#allocation5], 0 }
   0x5   :  { %16 = vsyncpa [#allocation5 + $0x1], 0 }
   0x6   :  { %17 = vsyncpa [#allocation8], 0 }
   0x7   :  { %18 = vsyncpa [#allocation11], 0 }
   0x8   :  { %19 = vsyncpa [#allocation6], 0 }
   0x9   :  { %21 = vsyncpa [#allocation6 + $0x1], 0  ;;  %s1868_s30 = smov 0   ;;  %s1870_s10 = smov 0  }
   0xa   :  { %s1872_s11 = smov 0   ;;  %s1874_s12 = smov 0  }
   0xb   :  { %s1876_s13 = smov 0   ;;  %s1878_s14 = smov 0  }
   0xc LB: > { %2274 = sst [smem:[#allocation17_spill]] %s1781_s30  ;;  %s1311_s15 = sadd.s32 4294967295, %s1801_s14   ;;  %s1801_s14 = sphi %s1878_s14, %s27_s14   ;;  %s1797_s13 = sphi %s1876_s13, %s2302_s13   ;;  %s1793_s12 = sphi %s1874_s12, %s2301_s12   ;;  %s1789_s11 = sphi %s1872_s11, %s2300_s11   ;;  %s1785_s10 = sphi %s1870_s10, %s2299_s10   ;;  %s1781_s30 = sphi %s1868_s30, %s2298_s30  }
   0xd   : > { %2275 = sst [smem:[#allocation18_spill]] %s1793_s12  ;;  %s1312_s16 = sadd.s32 4294967294, %s1801_s14  }
   0xe   : > { %p59_p0 = scmp.ne.s32.totalorder %s1785_s10, %s1781_s30  ;;  %p1902_p1 = scmp.eq.s32.totalorder %s1311_s15, 0 }
   0xf   : > { %p1906_p2 = scmp.eq.s32.totalorder %s1311_s15, 1  ;;  %p257_p3 = scmp.eq.s32.totalorder %s1312_s16, 1 }
  0x10   : > { %s2276_s17 = scalar_select %p1902_p1, 1, 0 }
  0x11   : > { %s2277_s18 = scalar_select %p1906_p2, 1, 0 }
  0x12   : > { %p1912_p4 = por %p1902_p1, %p59_p0  ;;  %p1313_p5 = scmp.ge.s32.totalorder %s1801_s14, 1 }
  0x13   : > { %p1917_p6 = por %p257_p3, %p59_p0  ;;  %p264_p7 = scmp.lt.s32.totalorder %s1801_s14, 3 }
  0x14   : > { %s2278_s19 = scalar_select %p1912_p4, 1, 0 }
  0x15   : > { %s2279_s20 = scalar_select %p1917_p6, 1, 0 }
  0x16   : > { %p1922_p8 = pnand %p1313_p5, %p264_p7  ;;  %s1803_s22 = smov [#allocation7]  }
  0x17   : > { %2280 = sst [smem:[#allocation19_spill]] %s2279_s20  ;;  %s276_s23 = sshll.u32 %s1803_s22, 4  ;;  %s1926_s23 = int_to_ptr.vmem [resolvable:$true] %s276_s23 }
  0x18   : > { %s2281_s21 = scalar_select %p1922_p8, 1, 0 }
  0x19   : > { %p1478_p9 = pneg %p1922_p8  ;;  %s1804_s25 = smov [#allocation9]  }
  0x1a   : > { %s289_s26 = sshll.u32 %s1804_s25, 4  ;;  %s1805_s27 = smov [#allocation10]   ;;  %s1937_s26 = int_to_ptr.vmem [resolvable:$true] %s289_s26 }
  0x1b   : > { %p1933_p11 = pnand %p1478_p9, %p1902_p1  ;;  %s1939_s28 = sshll.u32 %s1805_s27, 4  ;;  %s303_s28 = int_to_ptr.vmem [resolvable:$true] %s1939_s28 }
  0x1c   : > { %s1597_s16 = scalar_lea.hbm %s2254_s1, 256 }
  0x1d   : > { %p1598_p12 = scmp.ne.s32.totalorder %s2254_s1, %s1597_s16  ;;  %p1949_p13 = pneg %p1933_p11 }
  0x1e   : > { %p1604_p5 = scmp.lt.u32.totalorder %s1597_s16, %s2254_s1 }
  0x1f   : > { %p1600_p0 = pnand %p1949_p13, %p1598_p12 }
  0x21   : > { %p1601_p3 = pneg %p1600_p0 }
  0x23   : > { %p1606_p7 = pnand %p1604_p5, %p1601_p3 }
  0x25   : > { %1609 = shalt.err (!%p1606_p7)
}
  0x26   : > { %s1610_s20 = scalar_lea.vmem %s1926_s23, 256  ;;  %p1618_p1 = scmp.lt.s32.totalorder %s1926_s23, %s1926_s23 }
  0x27   : > { %p1611_p9 = scmp.ne.s32.totalorder %s1926_s23, %s1610_s20  ;;  %p1619_p4 = scmp.lt.s32.totalorder %s1610_s20, %s1610_s20 }
  0x29   : > { %p1613_p10 = pnand %p1611_p9, %p1949_p13  ;;  %p1620_p12 = por %p1619_p4, %p1618_p1 }
  0x2b   : > { %p1614_p6 = pneg %p1613_p10 }
  0x2d   : > { %p1621_p0 = pnand %p1620_p12, %p1614_p6 }
  0x2f   : > { %1624 = shalt.err (!%p1621_p0)
}
  0x30   : > { %s1806_s29 = smov 64   ;;  %s1807_s15 = smov 4  }
  0x31   : > { %1481 = dma.hbm_to_vmem [thread:$0]  (!%p1933_p11), %s2254_s1, 256, %s1926_s23, [#allocation8], %s1806_s29, %s1806_s29, %s1807_s15  }
  0x32   : > { %s1625_s20 = scalar_lea.hbm %s2255_s2, 256 }
  0x33   : > { %p1626_p1 = scmp.ne.s32.totalorder %s2255_s2, %s1625_s20  ;;  %p1632_p10 = scmp.lt.u32.totalorder %s1625_s20, %s2255_s2 }
  0x35   : > { %p1628_p4 = pnand %p1626_p1, %p1949_p13 }
  0x37   : > { %p1629_p6 = pneg %p1628_p4 }
  0x39   : > { %p1634_p3 = pnand %p1632_p10, %p1629_p6 }
  0x3b   : > { %1637 = shalt.err (!%p1634_p3)
}
  0x3c   : > { %s1638_s23 = scalar_lea.vmem %s1937_s26, 256  ;;  %p1646_p12 = scmp.lt.s32.totalorder %s1937_s26, %s1937_s26 }
  0x3d   : > { %p1639_p5 = scmp.ne.s32.totalorder %s1937_s26, %s1638_s23  ;;  %p1647_p0 = scmp.lt.s32.totalorder %s1638_s23, %s1638_s23 }
  0x3f   : > { %p1641_p7 = pnand %p1639_p5, %p1949_p13  ;;  %p1648_p1 = por %p1647_p0, %p1646_p12 }
  0x41   : > { %p1642_p9 = pneg %p1641_p7 }
  0x43   : > { %p1649_p4 = pnand %p1648_p1, %p1642_p9 }
  0x45   : > { %1652 = shalt.err (!%p1649_p4)
}
  0x46   : > { %1484 = dma.hbm_to_vmem [thread:$0]  (!%p1933_p11), %s2255_s2, 256, %s1937_s26, [#allocation8], %s1806_s29, %s1806_s29, %s1807_s15  }
  0x47   : > { %s1653_s16 = scalar_lea.hbm %s2256_s3, 256 }
  0x48   : > { %p1654_p6 = scmp.ne.s32.totalorder %s2256_s3, %s1653_s16  ;;  %p1660_p5 = scmp.lt.u32.totalorder %s1653_s16, %s2256_s3 }
  0x4a   : > { %p1656_p10 = pnand %p1654_p6, %p1949_p13 }
  0x4c   : > { %p1657_p3 = pneg %p1656_p10 }
  0x4e   : > { %p1662_p7 = pnand %p1660_p5, %p1657_p3 }
  0x50   : > { %1665 = shalt.err (!%p1662_p7)
}
  0x51   : > { %s1666_s23 = scalar_lea.vmem %s303_s28, 256  ;;  %p1674_p1 = scmp.lt.s32.totalorder %s303_s28, %s303_s28 }
  0x52   : > { %p1667_p9 = scmp.ne.s32.totalorder %s303_s28, %s1666_s23  ;;  %p1675_p4 = scmp.lt.s32.totalorder %s1666_s23, %s1666_s23 }
  0x54   : > { %p1669_p12 = pnand %p1667_p9, %p1949_p13  ;;  %p1676_p8 = por %p1675_p4, %p1674_p1 }
  0x56   : > { %p1670_p0 = pneg %p1669_p12 }
  0x58   : > { %p1677_p2 = pnand %p1676_p8, %p1670_p0 }
  0x5a   : > { %1680 = shalt.err (!%p1677_p2)
}
  0x5b   : > { %1487 = dma.hbm_to_vmem [thread:$0]  (!%p1933_p11), %s2256_s3, 256, %s303_s28, [#allocation11], %s1806_s29, %s1806_s29, %s1807_s15  }
  0x5c   : > { %s46_s30 = sadd.s32 1, %s1789_s11  ;;  %s39_s24 = sadd.s32 1, %s1797_s13 }
  0x5d   : > { %p53_p2 = scmp.ne.s32.totalorder %s1789_s11, %s1785_s10  ;;  %p41_p8 = scmp.ge.s32.totalorder %s39_s24, 2 }
  0x5e   : > { %p54_p13 = scmp.eq.s32.totalorder %s1801_s14, 0  ;;  %p2284_p6 = scmp.ne.s32.totalorder %s2277_s18, 0 }
  0x5f   : > { %p1499_p3 = scmp.lt.s32.totalorder %s1801_s14, 2  ;;  %s2304_s24 = smov (%p41_p8, %s39_s24), 0 }
  0x60   : > { %p2028_p10 = por %p2284_p6, %p53_p2  ;;  %p55_p5 = por %p54_p13, %p53_p2 }
  0x61   : > { %s331_s9 = sand.u32 1, %s1789_s11   ;;  %s43_s12 = ssub.s32 %s1797_s13, %s2304_s24 }
  0x62   : > { %p44_p7 = scmp.eq.s32.totalorder %s43_s12, 0  ;;  %s1318_s28 = sshll.u32 %s331_s9, 2 }
  0x63   : > { %s1319_s29 = sshll.u32 %s1797_s13, 6  ;;  %s335_s25 = scalar_lea.vmem [#allocation4], %s1318_s28 }
  0x64   : > { %s2040_s15 = scalar_select %p44_p7, %s1789_s11, %s46_s30  }
  0x65   : > { %s2045_s18 = scalar_lea.hbm %s2253_s0, %s1319_s29  ;;  %s342_s27 = sshll.u32 %s335_s25, 4  ;;  %s2047_s27 = int_to_ptr.vmem [resolvable:$true] %s342_s27 }
  0x66   : > { %p2051_p11 = pnand %p1499_p3, %p55_p5  ;;  %s332_s23 = scalar_lea.sflag [#allocation5], %s331_s9 }
  0x67   : > { %s1681_s26 = scalar_lea.hbm %s2045_s18, 64  ;;  %s1686_s12 = scalar_lea.hbm %s2253_s0, 128 }
  0x68   : > { %p1682_p9 = scmp.ne.s32.totalorder %s2045_s18, %s1681_s26  ;;  %p1683_p12 = pneg %p2051_p11 }
  0x69   : > { %p1687_p4 = scmp.lt.u32.totalorder %s2045_s18, %s2253_s0  ;;  %p1688_p2 = scmp.lt.u32.totalorder %s1686_s12, %s1681_s26 }
  0x6a   : > { %p1684_p0 = pnand %p1683_p12, %p1682_p9  ;;  %p1690_p13 = scmp.lt.u32.totalorder %s1681_s26, %s2045_s18 }
  0x6b   : > { %p1689_p8 = por %p1688_p2, %p1687_p4 }
  0x6c   : > { %p1685_p1 = pneg %p1684_p0 }
  0x6d   : > { %p1691_p6 = por %p1690_p13, %p1689_p8 }
  0x6f   : > { %p1692_p3 = pnand %p1691_p6, %p1685_p1 }
  0x71   : > { %1695 = shalt.err (!%p1692_p3)
}
  0x72   : > { %s1696_s9 = scalar_lea.vmem %s2047_s27, 64  ;;  %s1808_s16 = smov [#allocation4]  }
  0x73   : > { %p1697_p5 = scmp.ne.s32.totalorder %s2047_s27, %s1696_s9  ;;  %s1701_s22 = sshll.u32 %s1808_s16, 4  ;;  %s1702_s22 = int_to_ptr.vmem [resolvable:$false] %s1701_s22 }
  0x74   : > { %s1703_s25 = scalar_lea.vmem %s1702_s22, 128  ;;  %p1704_p0 = scmp.lt.s32.totalorder %s2047_s27, %s1702_s22 }
  0x75   : > { %p1699_p7 = pnand %p1697_p5, %p1683_p12  ;;  %p1705_p4 = scmp.lt.s32.totalorder %s1703_s25, %s1696_s9 }
  0x77   : > { %p1700_p9 = pneg %p1699_p7  ;;  %p1706_p2 = por %p1705_p4, %p1704_p0 }
  0x79   : > { %p1707_p8 = pnand %p1706_p2, %p1700_p9 }
  0x7b   : > { %1710 = shalt.err (!%p1707_p8)
}
  0x7c   : > { %1491 = dma.hbm_to_vmem [thread:$0]  (!%p2051_p11), %s2045_s18, 64, %s2047_s27, %s332_s23  }
  0x7d   : > { %p2287_p1 = scmp.ne.s32.totalorder %s2281_s21, 0 }
  0x7e   : > { %s2083_s26 = sand.u32 (!%p2287_p1), 1, %s1785_s10   ;;  %p2288_p12 = scmp.ne.s32.totalorder (!%p2287_p1), %s2278_s19, 0 }
  0x7f   : > { %351 = sbr.rel (%p2287_p1) target bundleno = 1456 (0x5b0), region = 56  ;;  %s1321_s7 = sshll.u32 (!%p2287_p1), %s2083_s26, 2 }
  0x80   : > { %s354_s30 = scalar_lea.sflag (!%p2287_p1), [#allocation5], %s2083_s26  ;;  %s357_s12 = scalar_lea.vmem (!%p2287_p1), [#allocation4], %s1321_s7 }
  0x86   : > { %1764 = dma.done.wait (%p2288_p12), %s354_s30, 64  }
  0x87   : > { %1766 = vsyncadd (%p2288_p12), %s354_s30, 4294967232  ;;  %p2289_p13 = scmp.ne.s32.totalorder %s2276_s17, 0 }
  0x89   : > { %1768 = dma.done.wait (%p2289_p13), [#allocation8], 512  }
  0x8a   : > { %1770 = vsyncadd (%p2289_p13), [#allocation8], 4294966784 }
  0x8b   : > { %1772 = dma.done.wait (%p2289_p13), [#allocation11], 256  }
  0x8c   : > { %1774 = vsyncadd (%p2289_p13), [#allocation11], 4294967040  ;;  %vm409_vm0 = vcmask 261120   ;;  %v1809_v0 = vmov 0.0   ;;  %vm1810_vm1 = vmmov 0   ;;  %v1565_v1 = vld [vmem:[#allocation9] sm:$0xff]  }
  0x8d   : > { %1390 = vmatprep.subr.bf16.mxu1 %v1809_v0  ;;  %1382 = vmatprep.subr.bf16.mxu0 %v1809_v0  ;;  %410 = vst.msk [vmem:[#allocation2] sm:$0xff] %vm409_vm0, %v1809_v0  ;;  %v1566_v2 = vld [vmem:[#allocation7] sm:$0xff]   ;;  %v1567_v3 = vld [vmem:[#allocation9 + $0x8] sm:$0xff]   ;;  %v1568_v5 = vld [vmem:[#allocation7 + $0x8] sm:$0xff]   ;;  %vm618_vm2 = vcmask 64512   ;;  %s1811_s27 = smov 112  }
  0x8e   : > { %1394 = vmatprep.mubr.msk.bf16.mxu1 %vm1810_vm1, %v1809_v0  ;;  %1386 = vmatprep.mubr.msk.bf16.mxu0 %vm1810_vm1, %v1809_v0  ;;  %v411_v4 = vld [vmem:[%s357_s12] sm:$0xf]  ;;  %s1812_s20 = smov 120   ;;  %s1813_s23 = smov 104   ;;  %v1569_v21 = vld [vmem:[#allocation10] sm:$0xff]   ;;  %v1570_v22 = vld [vmem:[#allocation10 + $0x8] sm:$0xff]  }
  0x8f   : > { %1391 = vmatpush3.bf16.msra.mxu1 %v1565_v1  ;;  %1383 = vmatpush3.bf16.msra.mxu0 %v1566_v2  ;;  %v1330_v6 = vld [vmem:[%s2258_s5] ss:$0 sm:$0xff]  ;;  %vm683_vm3 = vcmask 1043456   ;;  %s1814_s9 = smov 8   ;;  %s2290_s25 = sld [smem:[#allocation20_spill]]  ;;  %vm854_vm4 = vcmask 130112  }
  0x90   : > { %1392 = vmatprep.subr.bf16.mxu1 %v1809_v0  ;;  %1384 = vmatprep.subr.bf16.mxu0 %v1809_v0  ;;  %v1326_v7 = vld [vmem:[%s2257_s4] ss:$0 sm:$0xff]  ;;  %s1815_s12 = smov 16   ;;  %s1816_s17 = smov 24   ;;  %vm976_vm5 = vcmask 195712   ;;  %vm1098_vm6 = vcmask 261312  }
  0x91   : > { %v1334_v37 = vld [vmem:[%s2259_s6] ss:$0 sm:$0xff]  ;;  %s2291_s19 = sld [smem:[#allocation18_spill]]  ;;  %s1325_s21 = sshll.u32 %s2083_s26, 3 }
  0x92   : > { %s403_s28 = scalar_lea.vmem [#allocation12], %s1325_s21  ;;  %s2293_s22 = sld [smem:[#allocation22_spill]] }
  0x93   : > { %1393 = vmatpush3.bf16.msra.mxu1 %v1567_v3  ;;  %1385 = vmatpush3.bf16.msra.mxu0 %v1568_v5  ;;  %s1193_s29 = sshll.u32 %s403_s28, 4  ;;  %s1180_s30 = scalar_lea.sflag [#allocation6], %s2083_s26  ;;  %s2205_s29 = int_to_ptr.vmem [resolvable:$true] %s1193_s29 }
  0x94   : > { %1406 = vmatprep.subr.bf16.mxu1 %v1809_v0  ;;  %1398 = vmatprep.subr.bf16.mxu0 %v1809_v0 }
  0x96   : > { %1395 = vmatmul.mubr.msk.bf16.vlgmr.msra.gmra.mrb[0].mxu1 %vm409_vm0, %v411_v4  ;;  %1387 = vmatmul.mubr.msk.bf16.vlgmr.msra.gmra.mrb[0].mxu0 %vm409_vm0, %v411_v4 }
  0x97   : > { %1408 = vmatprep.mubr.msk.bf16.mxu1 %vm1810_vm1, %v1809_v0  ;;  %1402 = vmatprep.mubr.msk.bf16.mxu0 %vm1810_vm1, %v1809_v0 }
  0x98   : > { %1399 = vmatpush3.bf16.msra.mxu0 %v1569_v21 }
  0x99   : > { %1400 = vmatprep.subr.bf16.mxu0 %v1809_v0 }
  0x9c   : > { %1401 = vmatpush3.bf16.msra.mxu0 %v1570_v22 }
  0x9d   : > { %1412 = vmatprep.subr.bf16.mxu0 %v1809_v0 }
  0x9f   : > { %1403 = vmatmul.mubr.msk.bf16.vlgmr.msra.gmra.mrb[4].mxu0 %vm409_vm0, %v411_v4 }
  0xa0   : > { %1414 = vmatprep.mubr.msk.bf16.mxu0 %vm1810_vm1, %v1809_v0 }
 0x169   : > { %v544_v8 = vpop.f32.mrb[0].mxu1  ;;  %v477_v11 = vpop.f32.mrb[0].mxu0 }
 0x16a   : > { %v545_v9 = vadd.f32 %v1330_v6, %v544_v8  ;;  %v1396_v10 = vpop.f32.mrb[1].mxu1  ;;  %v478_v13 = vadd.f32 %v1326_v7, %v477_v11  ;;  %v1388_v14 = vpop.f32.mrb[1].mxu0 }
 0x16b   : > { %v547_v12 = vpop.f32.mrb[2].mxu1  ;;  %v480_v17 = vpop.f32.mrb[2].mxu0 }
 0x16c   : > { %v550_v15 = vpack.c.bf16 %v545_v9, %v545_v9  ;;  %v1397_v16 = vpop.f32.mrb[3].mxu1  ;;  %v1389_v18 = vpop.f32.mrb[3].mxu0  ;;  %v483_v19 = vpack.c.bf16 %v478_v13, %v478_v13 }
 0x16e   : > { %858 = vrot.lane.b32.xlu1 %v550_v15, %s1811_s27  ;;  %735 = vrot.lane.b32.xlu0 %v550_v15, %s1812_s20  ;;  %v623_v20 = vsel %vm618_vm2, %v550_v15, 0 }
 0x16f   : > { %1407 = vmatpush3.bf16.xpose.msra.mxu1 %v623_v20 }
 0x170   : > { %1418 = vmatprep.subr.bf16.mxu1 %v1809_v0 }
 0x172   : > { %856 = vrot.lane.b32.xlu1 %v483_v19, %s1811_s27  ;;  %732 = vrot.lane.b32.xlu0 %v483_v19, %s1812_s20  ;;  %v611_v38 = vpop.f32.mrb[4].mxu0 }
 0x173   : > { %v612_v39 = vadd.f32 %v1334_v37, %v611_v38  ;;  %v1404_v40 = vpop.f32.mrb[5].mxu0 }
 0x174   : > { %v614_v41 = vpop.f32.mrb[6].mxu0 }
 0x175   : > { %v1405_v42 = vpop.f32.mrb[7].mxu0  ;;  %v617_v43 = vpack.c.bf16 %v612_v39, %v612_v39 }
 0x176   : > { %978 = vrot.lane.b32.xlu1 %v483_v19, %s1813_s23  ;;  %980 = vrot.lane.b32.xlu0 %v550_v15, %s1813_s23 }
 0x177   : > { %1409 = vmatmul.mubr.msk.bf16.vlgmr.msra.gmra.mrb[4].mxu1 %vm618_vm2, %v483_v19  ;;  %v685_v44 = vsel %vm683_vm3, %v617_v43, 0 }
 0x178   : > { %1420 = vmatprep.mubr.msk.bf16.mxu1 %vm1810_vm1, %v1809_v0  ;;  %1413 = vmatpush3.bf16.msra.mxu0 %v685_v44 }
 0x179   : > { %1424 = vmatprep.subr.bf16.mxu0 %v1809_v0 }
 0x1e0   : > { %v736_v23 = vpop.permute.xlu0 %735  ;;  %v859_v25 = vpop.permute.xlu1 %858 }
 0x1e1   : > { %v741_v24 = vsel %vm618_vm2, %v736_v23, 0  ;;  %v864_v27 = vsel %vm618_vm2, %v859_v25, 0 }
 0x1e2   : > { %1419 = vmatpush3.bf16.xpose.msra.mxu1 %v741_v24 }
 0x1e3   : > { %1430 = vmatprep.subr.bf16.mxu1 %v1809_v0 }
 0x1e4   : > { %v733_v26 = vpop.permute.xlu0 %732  ;;  %v857_v29 = vpop.permute.xlu1 %856 }
 0x1e8   : > { %v981_v28 = vpop.permute.xlu0 %980  ;;  %v979_v31 = vpop.permute.xlu1 %978 }
 0x1e9   : > { %1421 = vmatmul.mubr.msk.bf16.vlgmr.msra.gmra.mrb[8].mxu1 %vm618_vm2, %v733_v26  ;;  %v986_v30 = vsel %vm618_vm2, %v981_v28, 0 }
 0x1ea   : > { %1431 = vmatpush3.bf16.xpose.msra.mxu1 %v864_v27  ;;  %1432 = vmatprep.mubr.msk.bf16.mxu1 %vm1810_vm1, %v1809_v0 }
 0x1eb   : > { %1442 = vmatprep.subr.bf16.mxu1 %v1809_v0 }
 0x1f1   : > { %1433 = vmatmul.mubr.msk.bf16.vlgmr.msra.gmra.mrb[12].mxu1 %vm618_vm2, %v857_v29 }
 0x1f2   : > { %1443 = vmatpush3.bf16.xpose.msra.mxu1 %v986_v30  ;;  %1444 = vmatprep.mubr.msk.bf16.mxu1 %vm1810_vm1, %v1809_v0 }
 0x1f3   : > { %1454 = vmatprep.subr.bf16.mxu1 %v1809_v0 }
 0x1f9   : > { %1445 = vmatmul.mubr.msk.bf16.vlgmr.msra.gmra.mrb[16].mxu1 %vm618_vm2, %v979_v31 }
 0x1fa   : > { %1458 = vmatprep.mubr.msk.bf16.mxu1 %vm1810_vm1, %v1809_v0 }
 0x24a   : > { %v659_v32 = vpop.f32.mrb[4].mxu1 }
 0x24b   : > { %v1410_v33 = vpop.f32.mrb[5].mxu1  ;;  %v665_v34 = vsel %vm618_vm2, %v659_v32, -inf }
 0x24c   : > { %666 = vmax.xlane.f32.xlu0 %v665_v34  ;;  %v662_v35 = vpop.f32.mrb[6].mxu1 }
 0x24d   : > { %v1411_v36 = vpop.f32.mrb[7].mxu1 }
 0x2bc   : > { %v777_v45 = vpop.f32.mrb[8].mxu1 }
 0x2bd   : > { %v1422_v46 = vpop.f32.mrb[9].mxu1  ;;  %v783_v47 = vsel %vm618_vm2, %v777_v45, -inf }
 0x2be   : > { %784 = vmax.xlane.f32.xlu1 %v783_v47  ;;  %v780_v48 = vpop.f32.mrb[10].mxu1 }
 0x2bf   : > { %v1423_v49 = vpop.f32.mrb[11].mxu1 }
 0x2c4   : > { %v900_v50 = vpop.f32.mrb[12].mxu1 }
 0x2c5   : > { %v1434_v51 = vpop.f32.mrb[13].mxu1  ;;  %v906_v52 = vsel %vm618_vm2, %v900_v50, -inf }
 0x2c6   : > { %907 = vmax.xlane.f32.xlu0 %v906_v52  ;;  %v903_v53 = vpop.f32.mrb[14].mxu1 }
 0x2c7   : > { %v1435_v54 = vpop.f32.mrb[15].mxu1 }
 0x2cc   : > { %v1022_v55 = vpop.f32.mrb[16].mxu1 }
 0x2cd   : > { %v1446_v56 = vpop.f32.mrb[17].mxu1  ;;  %v1028_v57 = vsel %vm618_vm2, %v1022_v55, -inf }
 0x2ce   : > { %1029 = vmax.xlane.f32.xlu0 %v1028_v57  ;;  %v1025_v58 = vpop.f32.mrb[18].mxu1 }
 0x2cf   : > { %v1447_v59 = vpop.f32.mrb[19].mxu1  ;;  %799 = vrot.lane.b32.xlu1 %v617_v43, %s1812_s20  ;;  %s2292_s20 = sld [smem:[#allocation21_spill]] }
 0x2d3   : > { %1043 = vrot.lane.b32.xlu1 %v617_v43, %s1813_s23  ;;  %s1351_s23 = sshll.u32 %s2291_s19, 7 }
 0x2d4   : > { %s2203_s7 = scalar_lea.hbm %s2293_s22, %s1351_s23 }
 0x2d9   : > { %v667_v60 = vpop.xlane.xlu0 %666 }
 0x2da   : > { %v671_v61 = vsub.f32 %v659_v32, %v667_v60  ;;  %v668_v31 = vsub.f32 -inf, %v667_v60 }
 0x2dc   : > { %v672_v62 = vmul.f32 1.442695, %v671_v61  ;;  %v669_v32 = vmul.f32 1.442695, %v668_v31 }
 0x2de   : > { %1573 = vpow2.f32 %v672_v62 }
 0x2e4   : > { %921 = vrot.lane.b32.xlu0 %v617_v43, %s1811_s27 }
 0x2e8   : > { %v1574_v63 = vpop.eup %1573 }
 0x2e9   : > { %v679_v1 = vpack.c.bf16 %v1574_v63, %v1574_v63  ;;  %v675_v18 = vsel %vm618_vm2, %v1574_v63, 0.0 }
 0x2eb   : > { %1415 = vmatmul.mubr.msk.bf16.vlgmr.msra.gmra.mrb[8].mxu0 %vm618_vm2, %v679_v1 }
 0x2ec   : > { %1426 = vmatprep.mubr.msk.bf16.mxu0 %vm1810_vm1, %v1809_v0 }
 0x34b   : > { %v785_v2 = vpop.xlane.xlu1 %784 }
 0x34c   : > { %v789_v3 = vsub.f32 %v777_v45, %v785_v2  ;;  %v786_v41 = vsub.f32 -inf, %v785_v2 }
 0x34e   : > { %v790_v4 = vmul.f32 1.442695, %v789_v3  ;;  %v787_v42 = vmul.f32 1.442695, %v786_v41  ;;  %v1571_v3 = vld [vmem:[%s2290_s25] sm:$0xff]  }
 0x34f   : > { %v800_v5 = vpop.permute.xlu1 %799  ;;  %1455 = vmatpush3.bf16.msra.mxu1 %v1571_v3 }
 0x350   : > { %v805_v6 = vsel %vm683_vm3, %v800_v5, 0  ;;  %1575 = vpow2.f32 %v790_v4  ;;  %1456 = vmatprep.subr.bf16.mxu1 %v1809_v0 }
 0x351   : > { %1425 = vmatpush3.bf16.msra.mxu0 %v805_v6 }
 0x352   : > { %1436 = vmatprep.subr.bf16.mxu0 %v1809_v0 }
 0x353   : > { %v908_v7 = vpop.xlane.xlu0 %907  ;;  %v1044_v20 = vpop.permute.xlu1 %1043 }
 0x354   : > { %v912_v8 = vsub.f32 %v900_v50, %v908_v7  ;;  %v1049_v23 = vsel %vm683_vm3, %v1044_v20, 0  ;;  %v909_v43 = vsub.f32 -inf, %v908_v7 }
 0x356   : > { %v913_v9 = vmul.f32 1.442695, %v912_v8  ;;  %v910_v44 = vmul.f32 1.442695, %v909_v43  ;;  %v1572_v8 = vld [vmem:[%s2290_s25 + $0x8] sm:$0xff]  }
 0x357   : > { %1457 = vmatpush3.bf16.msra.mxu1 %v1572_v8 }
 0x358   : > { %1577 = vpow2.f32 %v913_v9 }
 0x35a   : > { %v1576_v10 = vpop.eup %1575 }
 0x35b   : > { %v1030_v11 = vpop.xlane.xlu0 %1029  ;;  %v793_v13 = vsel %vm618_vm2, %v1576_v10, 0.0  ;;  %v797_v14 = vpack.c.bf16 %v1576_v10, %v1576_v10 }
 0x35c   : > { %v1034_v12 = vsub.f32 %v1022_v55, %v1030_v11  ;;  %794 = vadd.xlane.f32.xlu1 %v793_v13  ;;  %v1031_v45 = vsub.f32 -inf, %v1030_v11 }
 0x35d   : > { %1427 = vmatmul.mubr.msk.bf16.vlgmr.msra.gmra.mrb[12].mxu0 %vm618_vm2, %v797_v14 }
 0x35e   : > { %v1035_v15 = vmul.f32 1.442695, %v1034_v12  ;;  %1438 = vmatprep.mubr.msk.bf16.mxu0 %vm1810_vm1, %v1809_v0  ;;  %v1032_v47 = vmul.f32 1.442695, %v1031_v45 }
 0x35f   : > { %v922_v16 = vpop.permute.xlu0 %921 }
 0x360   : > { %v927_v17 = vsel %vm683_vm3, %v922_v16, 0  ;;  %1579 = vpow2.f32 %v1035_v15  ;;  %676 = vadd.xlane.f32.xlu1 %v675_v18 }
 0x361   : > { %1437 = vmatpush3.bf16.msra.mxu0 %v927_v17  ;;  %1581 = vpow2.f32 %v669_v32 }
 0x362   : > { %1448 = vmatprep.subr.bf16.mxu0 %v1809_v0  ;;  %v1578_v19 = vpop.eup %1577 }
 0x363   : > { %v916_v21 = vsel %vm618_vm2, %v1578_v19, 0.0  ;;  %v920_v22 = vpack.c.bf16 %v1578_v19, %v1578_v19 }
 0x364   : > { %917 = vadd.xlane.f32.xlu0 %v916_v21 }
 0x365   : > { %1439 = vmatmul.mubr.msk.bf16.vlgmr.msra.gmra.mrb[16].mxu0 %vm618_vm2, %v920_v22  ;;  %v1100_v22 = vld [vmem:[#allocation2] sm:$0xff] }
 0x366   : > { %1449 = vmatpush3.bf16.msra.mxu0 %v1049_v23  ;;  %1450 = vmatprep.mubr.msk.bf16.mxu0 %vm1810_vm1, %v1809_v0 }
 0x36a   : > { %v1580_v24 = vpop.eup %1579 }
 0x36b   : > { %v1038_v25 = vsel %vm618_vm2, %v1580_v24, 0.0  ;;  %v1042_v26 = vpack.c.bf16 %v1580_v24, %v1580_v24  ;;  %v1582_v33 = vpop.eup %1581 }
 0x36c   : > { %1039 = vadd.xlane.f32.xlu0 %v1038_v25  ;;  %v674_v35 = vmul.f32 0.0, %v1582_v33 }
 0x36d   : > { %1451 = vmatmul.mubr.msk.bf16.vlgmr.msra.gmra.mrb[20].mxu0 %vm618_vm2, %v1042_v26 }
 0x3be   : > { %v721_v27 = vpop.f32.mrb[8].mxu0 }
 0x3bf   : > { %v1416_v28 = vpop.f32.mrb[9].mxu0  ;;  %v727_v38 = vadd.f32 %v721_v27, %v674_v35 }
 0x3c0   : > { %v724_v29 = vpop.f32.mrb[10].mxu0  ;;  %v1349_v28 = vld [vmem:[%s2292_s20] ss:$0 sm:$0xff] }
 0x3c1   : > { %v1417_v30 = vpop.f32.mrb[11].mxu0 }
 0x3e9   : > { %v795_v34 = vpop.xlane.xlu1 %794 }
 0x3ed   : > { %v677_v36 = vpop.xlane.xlu1 %676 }
 0x3ee   : > { %v678_v37 = vadd.f32 %v677_v36, %v674_v35 }
 0x3f0   : > { %1583 = vrcp.f32 %v678_v37 }
 0x3f1   : > { %1585 = vpow2.f32 %v787_v42  ;;  %v918_v51 = vpop.xlane.xlu0 %917 }
 0x3f2   : > { %1587 = vpow2.f32 %v910_v44 }
 0x3f3   : > { %1589 = vpow2.f32 %v1032_v47 }
 0x3f9   : > { %v1040_v56 = vpop.xlane.xlu0 %1039 }
 0x3fa   : > { %v1584_v39 = vpop.eup %1583 }
 0x3fb   : > { %v729_v40 = vmul.f32 %v1584_v39, %v727_v38  ;;  %v1586_v46 = vpop.eup %1585 }
 0x3fc   : > { %v792_v48 = vmul.f32 0.0, %v1586_v46  ;;  %v1588_v50 = vpop.eup %1587 }
 0x3fd   : > { %730 = vst.msk [vmem:[#allocation3] sm:$0xff] %vm618_vm2, %v729_v40  ;;  %v915_v52 = vmul.f32 0.0, %v1588_v50  ;;  %v1590_v54 = vpop.eup %1589 }
 0x3fe   : > { %v796_v49 = vadd.f32 %v795_v34, %v792_v48  ;;  %v1037_v60 = vmul.f32 0.0, %v1590_v54 }
 0x3ff   : > { %v919_v53 = vadd.f32 %v918_v51, %v915_v52 }
 0x400   : > { %1591 = vrcp.f32 %v796_v49  ;;  %v1041_v1 = vadd.f32 %v1040_v56, %v1037_v60 }
 0x401   : > { %1593 = vrcp.f32 %v919_v53 }
 0x402   : > { %1595 = vrcp.f32 %v1041_v1 }
 0x40a   : > { %v1592_v59 = vpop.eup %1591 }
 0x40b   : > { %v1594_v6 = vpop.eup %1593 }
 0x40c   : > { %v1596_v14 = vpop.eup %1595 }
 0x430   : > { %v841_v55 = vpop.f32.mrb[12].mxu0 }
 0x431   : > { %v847_v57 = vadd.f32 %v841_v55, %v792_v48  ;;  %v1428_v58 = vpop.f32.mrb[13].mxu0 }
 0x432   : > { %v844_v61 = vpop.f32.mrb[14].mxu0 }
 0x433   : > { %v849_v62 = vmul.f32 %v1592_v59, %v847_v57  ;;  %v1429_v63 = vpop.f32.mrb[15].mxu0 }
 0x435   : > { %851 = vrot.lane.b32.xlu0 %v849_v62, %s1814_s9 }
 0x438   : > { %v963_v2 = vpop.f32.mrb[16].mxu0 }
 0x439   : > { %v969_v4 = vadd.f32 %v963_v2, %v915_v52  ;;  %v1440_v5 = vpop.f32.mrb[17].mxu0 }
 0x43a   : > { %v966_v7 = vpop.f32.mrb[18].mxu0 }
 0x43b   : > { %v971_v9 = vmul.f32 %v1594_v6, %v969_v4  ;;  %v1441_v10 = vpop.f32.mrb[19].mxu0 }
 0x43d   : > { %973 = vrot.lane.b32.xlu1 %v971_v9, %s1815_s12  ;;  %s1711_s12 = scalar_lea.vmem %s2205_s29, 128 }
 0x43e   : > { %p1712_p11 = scmp.ne.s32.totalorder %s2205_s29, %s1711_s12 }
 0x440   : > { %v1085_v11 = vpop.f32.mrb[20].mxu0  ;;  %p1713_p6 = pnand %p1712_p11, %p2028_p10 }
 0x441   : > { %v1091_v12 = vadd.f32 %v1085_v11, %v1037_v60  ;;  %v1452_v13 = vpop.f32.mrb[21].mxu0 }
 0x442   : > { %v1088_v15 = vpop.f32.mrb[22].mxu0  ;;  %p1714_p3 = pneg %p1713_p6 }
 0x443   : > { %v1093_v16 = vmul.f32 %v1596_v14, %v1091_v12  ;;  %v1453_v17 = vpop.f32.mrb[23].mxu0 }
 0x445   : > { %1095 = vrot.lane.b32.xlu1 %v1093_v16, %s1816_s17  ;;  %s1817_s17 = smov [#allocation12]  }
 0x446   : > { %s1715_s19 = sshll.u32 %s1817_s17, 4  ;;  %s1716_s19 = int_to_ptr.vmem [resolvable:$false] %s1715_s19 }
 0x447   : > { %s1717_s21 = scalar_lea.vmem %s1716_s19, 256  ;;  %p1718_p5 = scmp.lt.s32.totalorder %s2205_s29, %s1716_s19 }
 0x448   : > { %p1719_p7 = scmp.lt.s32.totalorder %s1717_s21, %s1711_s12 }
 0x44a   : > { %p1720_p9 = por %p1719_p7, %p1718_p5 }
 0x44c   : > { %p1721_p0 = pnand %p1720_p9, %p1714_p3 }
 0x4a7   : > { %v852_v18 = vpop.permute.xlu0 %851 }
 0x4a8   : > { %855 = vst.msk [vmem:[#allocation3] sm:$0xff] %vm854_vm4, %v852_v18 }
 0x4af   : > { %v974_v19 = vpop.permute.xlu1 %973 }
 0x4b0   : > { %977 = vst.msk [vmem:[#allocation3] sm:$0xff] %vm976_vm5, %v974_v19 }
 0x4b7   : > { %v1096_v0 = vpop.permute.xlu1 %1095 }
 0x4b8   : > { %1099 = vst.msk [vmem:[#allocation3] sm:$0xff] %vm1098_vm6, %v1096_v0 }
 0x4bf   : > { %v1101_v20 = vld [vmem:[#allocation3] sm:$0xff] }
 0x4c0   : > { %v1102_v21 = vpack.c.bf16 %v1101_v20, %v1101_v20 }
 0x4c2   : > { %1459 = vmatmul.mubr.msk.bf16.vlgmr.msra.gmra.mrb[20].mxu1 %vm409_vm0, %v1102_v21 }
 0x595   : > { %v1158_v23 = vpop.f32.mrb[20].mxu1 }
 0x596   : > { %v1164_v24 = vadd.f32 %v1158_v23, %v1100_v22  ;;  %v1460_v25 = vpop.f32.mrb[21].mxu1 }
 0x597   : > { %v1161_v26 = vpop.f32.mrb[22].mxu1 }
 0x598   : > { %1165 = vst.msk [vmem:[#allocation2] sm:$0xff] %vm409_vm0, %v1164_v24  ;;  %v1461_v27 = vpop.f32.mrb[23].mxu1 }
 0x59f   : > { %v1169_v29 = vld [vmem:[#allocation2] sm:$0xff] }
 0x5a0   : > { %v1177_v30 = vadd.f32 %v1349_v28, %v1169_v29 }
 0x5a2   : > { %1178 = vst.msk [vmem:[%s403_s28] sm:$0xff] %vm409_vm0, %v1177_v30 }
 0x5a3   : > { %1724 = shalt.err (!%p1721_p0)
}
 0x5a4   : > { %s1725_s26 = scalar_lea.hbm %s2203_s7, 128  ;;  %s1729_s20 = scalar_lea.hbm %s2293_s22, 256 }
 0x5a5   : > { %p1726_p4 = scmp.ne.s32.totalorder %s2203_s7, %s1725_s26  ;;  %p1730_p1 = scmp.lt.u32.totalorder %s2203_s7, %s2293_s22 }
 0x5a6   : > { %p1731_p12 = scmp.lt.u32.totalorder %s1729_s20, %s1725_s26  ;;  %p1733_p11 = scmp.lt.u32.totalorder %s1725_s26, %s2203_s7 }
 0x5a7   : > { %p1727_p2 = pnand %p1726_p4, %p2028_p10 }
 0x5a8   : > { %p1732_p13 = por %p1731_p12, %p1730_p1 }
 0x5a9   : > { %p1728_p8 = pneg %p1727_p2 }
 0x5aa   : > { %p1734_p6 = por %p1733_p11, %p1732_p13 }
 0x5ac   : > { %p1735_p3 = pnand %p1734_p6, %p1728_p8 }
 0x5ae   : > { %1738 = shalt.err (!%p1735_p3)
}
 0x5af   : > { %1476 = dma.vmem_to_hbm [thread:$0]  (%p2028_p10), %s2205_s29, 128, %s2203_s7, %s1180_s30  }
 0x5b0 PF: > { %s2294_s9 = sld [smem:[#allocation17_spill]]  ;;  %s2295_s16 = sld [smem:[#allocation19_spill]] }
 0x5b1   : > { %p2297_p7 = scmp.ge.s32.totalorder %s1801_s14, 2 }
 0x5b6   : > { %s1205_s12 = sand.u32 1, %s2294_s9   ;;  %p2296_p5 = scmp.ne.s32.totalorder %s2295_s16, 0 }
 0x5b7   : > { %s1206_s17 = scalar_lea.sflag [#allocation6], %s1205_s12 }
 0x5b8   : > { %p1493_p9 = pnand %p2297_p7, %p2296_p5 }
 0x5ba   : > { %1776 = dma.done.wait (!%p1493_p9), %s1206_s17, 128  }
 0x5bb   : > { %1778 = vsyncadd (!%p1493_p9), %s1206_s17, 4294967168  ;;  %s27_s14 = sadd.s32 1, %s1801_s14   ;;  %s2298_s30 = smov %s1785_s10 }
 0x5bc   : > { %p24_p0 = scmp.ge.s32.totalorder %s27_s14, 4   ;;  %s2299_s10 = smov %s1789_s11 }
 0x5bd   : > { %s2300_s11 = smov %s2040_s15  ;;  %s2301_s12 = smov %s1797_s13 }
 0x5be   : > { %s2302_s13 = smov %s2304_s24  ;;  %26 = sbr.rel (!%p24_p0) target bundleno = 12 (0xc), region = 128 }
 0x5c5   :  { %1211 = vsyncpa [#allocation5], 1 }
 0x5c6   :  { %1213 = vsyncpa [#allocation5 + $0x1], 1 }
 0x5c7   :  { %1214 = vsyncpa [#allocation8], 1 }
 0x5c8   :  { %1215 = vsyncpa [#allocation11], 1 }
 0x5c9   :  { %1216 = vsyncpa [#allocation6], 1 }
 0x5ca   :  { %1218 = vsyncpa [#allocation6 + $0x1], 1 }

</bundles_post_ra>
